<compile_context>
chip_gen: v7x
topology: tpu7x:2x2x1
jax: 0.10.0
libtpu: 0.0.40
codegen_flags: <defaults>
</compile_context>

<pallas_src>
import jax
import jax.numpy as jnp
from jax.experimental import pallas as pl
from jax.experimental.pallas import tpu as pltpu


def _round_up(n, m):
    return ((n + m - 1) // m) * m


def doc_tower_kernel(x_ref, w1_ref, b1_ref, w2_ref, b2_ref, o_ref, xk_ref):
    """x_ref: (bm, Din) f32 (unpadded K); weights pre-padded/cast; xk_ref: (bm, Din_p) bf16."""
    din = x_ref.shape[1]
    din_p = xk_ref.shape[1]

    # Cast f32 -> bf16 and zero-pad the contraction dim to the lane-aligned K scratch.
    # Re-zeroed every step (not gated on program_id) so it is megacore-safe; it's ~100 KiB
    # of VPU stores, negligible next to the matmuls.
    if din < din_p:
        xk_ref[...] = jnp.zeros_like(xk_ref)
    xk_ref[:, :din] = x_ref[...].astype(xk_ref.dtype)

    # Linear 1: bf16 MXU matmul with f32 accumulation, bias + ReLU on the VPU.
    h = jnp.dot(xk_ref[...], w1_ref[...], preferred_element_type=jnp.float32)
    h = jnp.maximum(h + b1_ref[...], 0.0)

    # Linear 2: bf16 MXU matmul with f32 accumulation.
    e = jnp.dot(h.astype(w2_ref.dtype), w2_ref[...],
                preferred_element_type=jnp.float32)
    e = e + b2_ref[...]

    # F.normalize(emb, p=2, dim=-1): e / max(||e||, 1e-12) == e * rsqrt(max(||e||^2, 1e-24)).
    sq = jnp.sum(e * e, axis=-1, keepdims=True)
    inv = jax.lax.rsqrt(jnp.maximum(sq, 1e-24))
    o_ref[...] = (e * inv).astype(o_ref.dtype)


def prepare_doc_tower_params(w1, b1, w2, b2, compute_dtype=jnp.bfloat16):
    """One-time prep of the (constant) tower weights: pad every feature dim to a
    multiple of 128 lanes and cast the matmul operands to the MXU compute dtype.

    w1: (Din, H); b1: (H,); w2: (H, O); b2: (O,) -- weights stored transposed
    (in, out) relative to torch.nn.Linear's (out, in). Zero padding is exact for
    matmul + bias + ReLU and does not perturb the L2 norm.
    """
    Din, H = w1.shape
    O = w2.shape[1]
    Din_p = _round_up(Din, 128)
    H_p = _round_up(H, 128)
    O_p = _round_up(O, 128)

    w1p = jnp.zeros((Din_p, H_p), compute_dtype).at[:Din, :H].set(
        w1.astype(compute_dtype))
    b1p = jnp.zeros((1, H_p), jnp.float32).at[:, :H].set(
        jnp.reshape(b1, (1, H)).astype(jnp.float32))
    w2p = jnp.zeros((H_p, O_p), compute_dtype).at[:H, :O].set(
        w2.astype(compute_dtype))
    b2p = jnp.zeros((1, O_p), jnp.float32).at[:, :O].set(
        jnp.reshape(b2, (1, O)).astype(jnp.float32))
    return {"w1": w1p, "b1": b1p, "w2": w2p, "b2": b2p, "dims": (Din, H, O)}


def doc_tower(x, params, *, bm=512, out_dtype=jnp.float32):
    """x: (B, Din) f32; params: output of prepare_doc_tower_params.
    Returns (B, O) L2-normalized embeddings (f32 by default; pass out_dtype=bf16 to
    halve output writeback if downstream accepts bf16 embeddings)."""
    Din, H, O = params["dims"]
    w1p, b1p, w2p, b2p = params["w1"], params["b1"], params["w2"], params["b2"]
    Din_p, H_p = w1p.shape
    O_p = w2p.shape[1]
    compute_dtype = w1p.dtype

    B = x.shape[0]
    assert x.shape[1] == Din, f"expected x feature dim {Din}, got {x.shape[1]}"

    # Batch tile: >= 2 grid steps whenever the batch allows (v7x shards the
    # 'parallel' axis across its 2 TensorCores; a single step idles one), while
    # large tiles (<= bm rows) amortize per-step overhead on v5e/v6e.
    B8 = _round_up(B, 8)
    bm = max(8, min(bm, _round_up(pl.cdiv(B8, 2), 8)))
    B_p = _round_up(B8, bm)

    # Only pad the batch (cheap, and usually a no-op); never re-pad/cast features in HBM.
    xp = x if B_p == B else jnp.pad(x, ((0, B_p - B), (0, 0)))

    grid = (B_p // bm,)
    w_itemsize = jnp.dtype(compute_dtype).itemsize
    out_itemsize = jnp.dtype(out_dtype).itemsize
    cost = pl.CostEstimate(
        flops=2 * B_p * (Din_p * H_p + H_p * O_p),
        transcendentals=B_p,
        bytes_accessed=B_p * Din * x.dtype.itemsize          # x read (f32, unpadded)
        + (w1p.size + w2p.size) * w_itemsize                  # bf16 weights
        + (b1p.size + b2p.size) * 4                           # f32 biases
        + B_p * O_p * out_itemsize,                           # output writeback
    )

    out = pl.pallas_call(
        doc_tower_kernel,
        out_shape=jax.ShapeDtypeStruct((B_p, O_p), out_dtype),
        grid_spec=pltpu.PrefetchScalarGridSpec(
            num_scalar_prefetch=0,
            grid=grid,
            in_specs=[
                # x tile, streamed, f32, unpadded K (last dim == full array dim is legal).
                pl.BlockSpec((bm, Din), lambda i: (i, 0)),
                pl.BlockSpec((Din_p, H_p), lambda i: (0, 0)),   # W1, VMEM-resident
                pl.BlockSpec((1, H_p), lambda i: (0, 0)),       # b1, resident
                pl.BlockSpec((H_p, O_p), lambda i: (0, 0)),     # W2, resident
                pl.BlockSpec((1, O_p), lambda i: (0, 0)),       # b2, resident
            ],
            out_specs=pl.BlockSpec((bm, O_p), lambda i: (i, 0)),  # lane-dense store
            scratch_shapes=[pltpu.VMEM((bm, Din_p), compute_dtype)],  # K-padded x tile
        ),
        compiler_params=pltpu.CompilerParams(
            dimension_semantics=("parallel",),
        ),
        cost_estimate=cost,
    )(xp, w1p, b1p, w2p, b2p)

    return out[:B, :O]


def reference(x, w1, b1, w2, b2, compute_dtype=jnp.bfloat16):
    # Pure-JAX reference mirroring the kernel's quantization points
    # (bf16 matmul operands, f32 accumulation, f32 epilogue).
    f32 = jnp.float32
    xd = x.astype(compute_dtype).astype(f32)
    w1d = w1.astype(compute_dtype).astype(f32)
    w2d = w2.astype(compute_dtype).astype(f32)
    h = jnp.maximum(xd @ w1d + b1.reshape(1, -1).astype(f32), 0.0)
    h = h.astype(compute_dtype).astype(f32)
    e = h @ w2d + b2.reshape(1, -1).astype(f32)
    n = jnp.sqrt(jnp.sum(e * e, axis=-1, keepdims=True))
    return e / jnp.maximum(n, 1e-12)


if __name__ == "__main__":
    # Module defaults: DocTower(input_dim=300, hidden_dim=256, output_dim=128).
    B, Din, H, O = 64, 300, 256, 128

    key = jax.random.PRNGKey(0)
    kx, kw1, kb1, kw2, kb2 = jax.random.split(key, 5)

    x = jax.random.normal(kx, (B, Din), dtype=jnp.float32)

    # torch.nn.Linear init: U(-1/sqrt(fan_in), +1/sqrt(fan_in)); weights stored
    # transposed (in, out) relative to PyTorch's (out, in).
    lim1 = 1.0 / (Din ** 0.5)
    lim2 = 1.0 / (H ** 0.5)
    w1 = jax.random.uniform(kw1, (Din, H), minval=-lim1, maxval=lim1, dtype=jnp.float32)
    b1 = jax.random.uniform(kb1, (H,), minval=-lim1, maxval=lim1, dtype=jnp.float32)
    w2 = jax.random.uniform(kw2, (H, O), minval=-lim2, maxval=lim2, dtype=jnp.float32)
    b2 = jax.random.uniform(kb2, (O,), minval=-lim2, maxval=lim2, dtype=jnp.float32)

    # One-time parameter prep (pad + bf16 cast), hoisted out of the per-call path.
    params = prepare_doc_tower_params(w1, b1, w2, b2)

    out = doc_tower(x, params)
    out = jax.block_until_ready(out)

    ref = reference(x, w1, b1, w2, b2)
    assert out.shape == (B, O)
    # bf16 matmul operands with f32 accumulation: only accumulation-order /
    # bf16-rounding noise remains vs the reference on the same rounded operands.
    assert jnp.allclose(out, ref, atol=1e-2, rtol=1e-2), "mismatch vs reference"

    print("KERNEL_OK")
</pallas_src>

<mosaic_0001>
module attributes {stable_mosaic.version = 11 : i64} {
  func.func @doc_tower_kernel(%arg0: i32, %arg1: memref<32x300xf32, #tpu.memory_space<vmem>>, %arg2: memref<384x256xbf16, #tpu.memory_space<vmem>>, %arg3: memref<1x256xf32, #tpu.memory_space<vmem>>, %arg4: memref<256x128xbf16, #tpu.memory_space<vmem>>, %arg5: memref<1x128xf32, #tpu.memory_space<vmem>>, %arg6: memref<32x128xf32, #tpu.memory_space<vmem>>, %arg7: memref<32x384xbf16, #tpu.memory_space<vmem>>) attributes {dimension_semantics = [#tpu.dimension_semantics<parallel>], iteration_bounds = array<i64: 2>, scalar_prefetch = 0 : i64, scratch_operands = 1 : i64, tpu.core_type = #tpu.core_type<tc>, window_params = [{transform_indices = @transform_0, window_bounds = array<i64: 32, 300>}, {pipeline_mode = #tpu.pipeline_mode<synchronous>, transform_indices = @transform_1, window_bounds = array<i64: 384, 256>}, {pipeline_mode = #tpu.pipeline_mode<synchronous>, transform_indices = @transform_2, window_bounds = array<i64: 1, 256>}, {pipeline_mode = #tpu.pipeline_mode<synchronous>, transform_indices = @transform_3, window_bounds = array<i64: 256, 128>}, {pipeline_mode = #tpu.pipeline_mode<synchronous>, transform_indices = @transform_4, window_bounds = array<i64: 1, 128>}, {transform_indices = @transform_5, window_bounds = array<i64: 32, 128>}]} {
    %cst = arith.constant 0.000000e+00 : bf16
    %0 = vector.broadcast %cst : bf16 to vector<32x384xbf16>
    %c0 = arith.constant 0 : index
    %c0_0 = arith.constant 0 : index
    %1 = vector.load %arg7[%c0, %c0_0] : memref<32x384xbf16, #tpu.memory_space<vmem>>, vector<32x384xbf16>
    tpu.vector_store %arg7[%c0, %c0_0], %0 {strides = array<i32>} : memref<32x384xbf16, #tpu.memory_space<vmem>>, vector<32x384xbf16>,
    %c0_1 = arith.constant 0 : index
    %c0_2 = arith.constant 0 : index
    %2 = vector.load %arg1[%c0_1, %c0_2] : memref<32x300xf32, #tpu.memory_space<vmem>>, vector<32x300xf32>
    %3 = arith.truncf %2 : vector<32x300xf32> to vector<32x300xbf16>
    %c0_3 = arith.constant 0 : index
    %c0_4 = arith.constant 0 : index
    %4 = vector.load %arg7[%c0_3, %c0_4] : memref<32x384xbf16, #tpu.memory_space<vmem>>, vector<32x300xbf16>
    tpu.vector_store %arg7[%c0_3, %c0_4], %3 {strides = array<i32>} : memref<32x384xbf16, #tpu.memory_space<vmem>>, vector<32x300xbf16>,
    %c0_5 = arith.constant 0 : index
    %c0_6 = arith.constant 0 : index
    %5 = vector.load %arg7[%c0_5, %c0_6] : memref<32x384xbf16, #tpu.memory_space<vmem>>, vector<32x384xbf16>
    %c0_7 = arith.constant 0 : index
    %c0_8 = arith.constant 0 : index
    %6 = vector.load %arg2[%c0_7, %c0_8] : memref<384x256xbf16, #tpu.memory_space<vmem>>, vector<384x256xbf16>
    %cst_9 = arith.constant dense<0.000000e+00> : vector<32x256xf32>
    %7 = tpu.matmul %5, %6, %cst_9 {dimension_numbers = #tpu.dot_dimension_numbers<[1], [0], [0], [1], [0, 0, 1, 1], [], []>} : vector<32x384xbf16>, vector<384x256xbf16>, vector<32x256xf32> -> vector<32x256xf32>
    %c0_10 = arith.constant 0 : index
    %c0_11 = arith.constant 0 : index
    %8 = vector.load %arg3[%c0_10, %c0_11] : memref<1x256xf32, #tpu.memory_space<vmem>>, vector<1x256xf32>
    %9 = vector.broadcast %8 : vector<1x256xf32> to vector<32x256xf32>
    %10 = arith.addf %7, %9 : vector<32x256xf32>
    %cst_12 = arith.constant 0.000000e+00 : f32
    %11 = vector.broadcast %cst_12 : f32 to vector<32x256xf32>
    %12 = arith.maximumf %10, %11 : vector<32x256xf32>
    %13 = arith.truncf %12 : vector<32x256xf32> to vector<32x256xbf16>
    %c0_13 = arith.constant 0 : index
    %c0_14 = arith.constant 0 : index
    %14 = vector.load %arg4[%c0_13, %c0_14] : memref<256x128xbf16, #tpu.memory_space<vmem>>, vector<256x128xbf16>
    %cst_15 = arith.constant dense<0.000000e+00> : vector<32x128xf32>
    %15 = tpu.matmul %13, %14, %cst_15 {dimension_numbers = #tpu.dot_dimension_numbers<[1], [0], [0], [1], [0, 0, 1, 1], [], []>} : vector<32x256xbf16>, vector<256x128xbf16>, vector<32x128xf32> -> vector<32x128xf32>
    %c0_16 = arith.constant 0 : index
    %c0_17 = arith.constant 0 : index
    %16 = vector.load %arg5[%c0_16, %c0_17] : memref<1x128xf32, #tpu.memory_space<vmem>>, vector<1x128xf32>
    %17 = vector.broadcast %16 : vector<1x128xf32> to vector<32x128xf32>
    %18 = arith.addf %15, %17 : vector<32x128xf32>
    %19 = arith.mulf %18, %18 : vector<32x128xf32>
    %cst_18 = arith.constant dense<0.000000e+00> : vector<32xf32>
    %20 = vector.multi_reduction <add>, %19, %cst_18 [1] : vector<32x128xf32> to vector<32xf32>
    %21 = vector.shape_cast %20 : vector<32xf32> to vector<32x1xf32>
    %cst_19 = arith.constant 1.000000e-24 : f32
    %22 = vector.broadcast %cst_19 : f32 to vector<32x1xf32>
    %23 = arith.maximumf %21, %22 : vector<32x1xf32>
    %24 = math.rsqrt %23 : vector<32x1xf32>
    %25 = vector.broadcast %24 : vector<32x1xf32> to vector<32x128xf32>
    %26 = arith.mulf %18, %25 : vector<32x128xf32>
    %c0_20 = arith.constant 0 : index
    %c0_21 = arith.constant 0 : index
    %27 = vector.load %arg6[%c0_20, %c0_21] : memref<32x128xf32, #tpu.memory_space<vmem>>, vector<32x128xf32>
    tpu.vector_store %arg6[%c0_20, %c0_21], %26 {strides = array<i32>} : memref<32x128xf32, #tpu.memory_space<vmem>>, vector<32x128xf32>,
    return
  }
  func.func @transform_0(%arg0: i32) -> (i32, i32) {
    %c0_i32 = arith.constant 0 : i32
    %c0_i32_0 = arith.constant 0 : i32
    return %arg0, %c0_i32 : i32, i32
  }
  func.func @transform_1(%arg0: i32) -> (i32, i32) {
    %c0_i32 = arith.constant 0 : i32
    %c0_i32_0 = arith.constant 0 : i32
    %c0_i32_1 = arith.constant 0 : i32
    return %c0_i32, %c0_i32_0 : i32, i32
  }
  func.func @transform_2(%arg0: i32) -> (i32, i32) {
    %c0_i32 = arith.constant 0 : i32
    %c0_i32_0 = arith.constant 0 : i32
    %c0_i32_1 = arith.constant 0 : i32
    return %c0_i32, %c0_i32_0 : i32, i32
  }
  func.func @transform_3(%arg0: i32) -> (i32, i32) {
    %c0_i32 = arith.constant 0 : i32
    %c0_i32_0 = arith.constant 0 : i32
    %c0_i32_1 = arith.constant 0 : i32
    return %c0_i32, %c0_i32_0 : i32, i32
  }
  func.func @transform_4(%arg0: i32) -> (i32, i32) {
    %c0_i32 = arith.constant 0 : i32
    %c0_i32_0 = arith.constant 0 : i32
    %c0_i32_1 = arith.constant 0 : i32
    return %c0_i32, %c0_i32_0 : i32, i32
  }
  func.func @transform_5(%arg0: i32) -> (i32, i32) {
    %c0_i32 = arith.constant 0 : i32
    %c0_i32_0 = arith.constant 0 : i32
    return %arg0, %c0_i32 : i32, i32
  }
}

</mosaic_0001>

<bundles_post_ra>
// kernel: tpu_custom_call.1
= control target key start
LH: loop header
LB: loop body
LE: loop exit
PB: predicated region body
PF: predicated region fallthrough
CT: control target
= control target key end

     0   :  { %10 = vsyncpa [#allocation4], 0  ;;  %s1837_s0 = inlined_call_operand.hbm [shape: f32[64,300], index: 0, kind: input, shape index: {}]   ;;  %s1838_s1 = inlined_call_operand.hbm [shape: bf16[384,256], index: 1, kind: input, shape index: {}]   ;;  %s1839_s2 = inlined_call_operand.vmem [shape: f32[1,256], index: 2, kind: input, shape index: {}]   ;;  %s1840_s3 = inlined_call_operand.hbm [shape: bf16[256,128], index: 3, kind: input, shape index: {}]   ;;  %s1841_s4 = inlined_call_operand.vmem [shape: f32[1,128], index: 4, kind: input, shape index: {}]   ;;  %s1842_s5 = inlined_call_operand.hbm [shape: f32[64,128], index: 5, kind: output, shape index: {}]  }
   0x1   :  { %12 = vsyncpa [#allocation4 + $0x1], 0 }
   0x2   :  { %13 = vsyncpa [#allocation7], 0 }
   0x3   :  { %14 = vsyncpa [#allocation5], 0 }
   0x4   :  { %16 = vsyncpa [#allocation5 + $0x1], 0  ;;  %s1552_s18 = smov 0   ;;  %s1554_s19 = smov 0  }
   0x5   :  { %s1556_s20 = smov 0   ;;  %s1558_s21 = smov 0  }
   0x6 LB: > { %s1573_s22 = sadd.s32 4294967295, %s1507_s21   ;;  %s1049_s23 = sadd.s32 4294967294, %s1507_s21   ;;  %s1507_s21 = sphi %s1558_s21, %s1862_s21   ;;  %s1503_s20 = sphi %s1556_s20, %s1861_s20   ;;  %s1499_s19 = sphi %s1554_s19, %s1860_s19   ;;  %s1495_s18 = sphi %s1552_s18, %s1859_s18  }
   0x7   : > { %p42_p0 = scmp.ne.s32.totalorder %s1499_s19, %s1495_s18  ;;  %p1843_p1 = scmp.eq.s32.totalorder %s1573_s22, 0 }
   0x8   : > { %p156_p3 = scmp.eq.s32.totalorder %s1049_s23, 1  ;;  %p1050_p5 = scmp.ge.s32.totalorder %s1507_s21, 1 }
   0x9   : > { %p1582_p4 = por %p1843_p1, %p42_p0  ;;  %p163_p7 = scmp.lt.s32.totalorder %s1507_s21, 3 }
   0xa   : > { %p1587_p6 = por %p156_p3, %p42_p0  ;;  %s1509_s27 = smov [#allocation6]  }
   0xb   : > { %s1846_s24 = scalar_select %p1582_p4, 1, 0 }
   0xc   : > { %s1847_s25 = scalar_select %p1587_p6, 1, 0 }
   0xd   : > { %p1592_p8 = pnand %p1050_p5, %p163_p7  ;;  %s175_s28 = sshll.u32 %s1509_s27, 4  ;;  %s1596_s28 = int_to_ptr.vmem [resolvable:$true] %s175_s28 }
   0xe   : > { %s1510_s30 = smov [#allocation8]   ;;  %s1351_s9 = scalar_lea.hbm %s1838_s1, 6144 }
   0xf   : > { %p1191_p9 = pneg %p1592_p8  ;;  %s191_s6 = sshll.u32 %s1510_s30, 4  ;;  %s1607_s6 = int_to_ptr.vmem [resolvable:$true] %s191_s6 }
  0x10   : > { %p1352_p12 = scmp.ne.s32.totalorder %s1838_s1, %s1351_s9  ;;  %p1358_p5 = scmp.lt.u32.totalorder %s1351_s9, %s1838_s1 }
  0x11   : > { %p1603_p11 = pnand %p1191_p9, %p1843_p1 }
  0x13   : > { %p1353_p13 = pneg %p1603_p11 }
  0x15   : > { %p1354_p0 = pnand %p1353_p13, %p1352_p12 }
  0x17   : > { %p1355_p3 = pneg %p1354_p0 }
  0x19   : > { %p1360_p7 = pnand %p1358_p5, %p1355_p3 }
  0x1b   : > { %1363 = shalt.err (!%p1360_p7)
}
  0x1c   : > { %s1364_s14 = scalar_lea.vmem %s1596_s28, 6144  ;;  %p1372_p2 = scmp.lt.s32.totalorder %s1596_s28, %s1596_s28 }
  0x1d   : > { %p1365_p9 = scmp.ne.s32.totalorder %s1596_s28, %s1364_s14  ;;  %p1373_p12 = scmp.lt.s32.totalorder %s1364_s14, %s1364_s14 }
  0x1f   : > { %p1367_p10 = pnand %p1365_p9, %p1353_p13  ;;  %p1374_p0 = por %p1373_p12, %p1372_p2 }
  0x21   : > { %p1368_p1 = pneg %p1367_p10 }
  0x23   : > { %p1375_p6 = pnand %p1374_p0, %p1368_p1 }
  0x25   : > { %1378 = shalt.err (!%p1375_p6)
}
  0x26   : > { %s1511_s15 = smov 128   ;;  %s1512_s16 = smov 8  }
  0x27   : > { %1194 = dma.hbm_to_vmem [thread:$0]  (!%p1603_p11), %s1838_s1, 6144, %s1596_s28, [#allocation7], %s1511_s15, %s1511_s15, %s1512_s16  }
  0x28   : > { %s1379_s7 = scalar_lea.hbm %s1840_s3, 2048 }
  0x29   : > { %p1380_p2 = scmp.ne.s32.totalorder %s1840_s3, %s1379_s7  ;;  %p1386_p10 = scmp.lt.u32.totalorder %s1379_s7, %s1840_s3 }
  0x2b   : > { %p1382_p1 = pnand %p1380_p2, %p1353_p13 }
  0x2d   : > { %p1383_p6 = pneg %p1382_p1 }
  0x2f   : > { %p1388_p3 = pnand %p1386_p10, %p1383_p6 }
  0x31   : > { %1391 = shalt.err (!%p1388_p3)
}
  0x32   : > { %s1392_s28 = scalar_lea.vmem %s1607_s6, 2048  ;;  %p1400_p12 = scmp.lt.s32.totalorder %s1607_s6, %s1607_s6 }
  0x33   : > { %p1393_p5 = scmp.ne.s32.totalorder %s1607_s6, %s1392_s28  ;;  %p1401_p0 = scmp.lt.s32.totalorder %s1392_s28, %s1392_s28 }
  0x35   : > { %p1395_p7 = pnand %p1393_p5, %p1353_p13  ;;  %p1402_p2 = por %p1401_p0, %p1400_p12 }
  0x37   : > { %p1396_p9 = pneg %p1395_p7 }
  0x39   : > { %p1403_p1 = pnand %p1402_p2, %p1396_p9 }
  0x3b   : > { %1406 = shalt.err (!%p1403_p1)
}
  0x3c   : > { %s1513_s12 = smov 64   ;;  %s1514_s13 = smov 4  }
  0x3d   : > { %1197 = dma.hbm_to_vmem [thread:$0]  (!%p1603_p11), %s1840_s3, 2048, %s1607_s6, [#allocation7], %s1513_s12, %s1513_s12, %s1514_s13  }
  0x3e   : > { %s1662_s16 = sadd.s32 1, %s1507_s21   ;;  %s29_s23 = sadd.s32 1, %s1503_s20 }
  0x3f   : > { %s26_s17 = ssub.s32 %s1507_s21, %s1662_s16  ;;  %p36_p6 = scmp.ne.s32.totalorder %s1503_s20, %s1499_s19 }
  0x40   : > { %p27_p13 = scmp.eq.s32.totalorder %s26_s17, 0  ;;  %p37_p10 = scmp.eq.s32.totalorder %s1507_s21, 0 }
  0x41   : > { %p1850_p5 = scmp.eq.s32.totalorder %s1573_s22, 1  ;;  %p1208_p9 = scmp.lt.s32.totalorder %s1507_s21, 2 }
  0x42   : > { %s1671_s27 = scalar_select %p27_p13, %s1503_s20, %s29_s23  }
  0x43   : > { %p38_p3 = por %p37_p10, %p36_p6  ;;  %p1675_p7 = por %p1850_p5, %p36_p6 }
  0x44   : > { %s208_s29 = sand.u32 1, %s1503_s20   ;;  %s1177_s6 = smul.u32 1536, %s1507_s21 }
  0x45   : > { %s1851_s30 = scalar_select %p1675_p7, 1, 0 }
  0x46   : > { %s1176_s7 = smul.u32 96, %s208_s29  ;;  %p1682_p11 = pnand %p1208_p9, %p38_p3 }
  0x47   : > { %s1689_s11 = scalar_lea.hbm %s1837_s0, %s1177_s6  ;;  %s1693_s13 = scalar_lea.sflag [#allocation4], %s208_s29 }
  0x48   : > { %s212_s28 = scalar_lea.vmem [#allocation3], %s1176_s7  ;;  %s1407_s14 = scalar_lea.hbm %s1689_s11, 1536 }
  0x49   : > { %s220_s12 = sshll.u32 %s212_s28, 4  ;;  %p1408_p12 = scmp.ne.s32.totalorder %s1689_s11, %s1407_s14  ;;  %s1691_s12 = int_to_ptr.vmem [resolvable:$true] %s220_s12 }
  0x4a   : > { %p1409_p0 = pneg %p1682_p11  ;;  %s1412_s23 = scalar_lea.hbm %s1837_s0, 3072 }
  0x4b   : > { %p1413_p13 = scmp.lt.u32.totalorder %s1689_s11, %s1837_s0  ;;  %p1414_p6 = scmp.lt.u32.totalorder %s1412_s23, %s1407_s14 }
  0x4c   : > { %p1410_p2 = pnand %p1409_p0, %p1408_p12  ;;  %p1416_p3 = scmp.lt.u32.totalorder %s1407_s14, %s1689_s11 }
  0x4d   : > { %p1415_p10 = por %p1414_p6, %p1413_p13 }
  0x4e   : > { %p1411_p1 = pneg %p1410_p2 }
  0x4f   : > { %p1417_p5 = por %p1416_p3, %p1415_p10 }
  0x51   : > { %p1418_p9 = pnand %p1417_p5, %p1411_p1 }
  0x53   : > { %1421 = shalt.err (!%p1418_p9)
}
  0x54   : > { %s1422_s29 = scalar_lea.vmem %s1691_s12, 1536  ;;  %s1515_s7 = smov [#allocation3]  }
  0x55   : > { %p1423_p12 = scmp.ne.s32.totalorder %s1691_s12, %s1422_s29  ;;  %s1427_s10 = sshll.u32 %s1515_s7, 4  ;;  %s1428_s10 = int_to_ptr.vmem [resolvable:$false] %s1427_s10 }
  0x56   : > { %s1429_s28 = scalar_lea.vmem %s1428_s10, 3072  ;;  %p1430_p4 = scmp.lt.s32.totalorder %s1691_s12, %s1428_s10 }
  0x57   : > { %p1425_p2 = pnand %p1423_p12, %p1409_p0  ;;  %p1431_p13 = scmp.lt.s32.totalorder %s1429_s28, %s1422_s29 }
  0x59   : > { %p1426_p7 = pneg %p1425_p2  ;;  %p1432_p6 = por %p1431_p13, %p1430_p4 }
  0x5b   : > { %p1433_p10 = pnand %p1432_p6, %p1426_p7 }
  0x5d   : > { %1436 = shalt.err (!%p1433_p10)
}
  0x5e   : > { %s1516_s14 = smov 384   ;;  %s1517_s15 = smov 24  }
  0x5f   : > { %1201 = dma.hbm_to_vmem [thread:$0]  (!%p1682_p11), %s1689_s11, 1536, %s1691_s12, %s1693_s13, %s1516_s14, %s1516_s14, %s1517_s15  }
  0x60   : > { %232 = sbr.rel (%p1592_p8) target bundleno = 799 (0x31f), region = 40  ;;  %s1724_s17 = sand.u32 (!%p1592_p8), 1, %s1499_s19  }
  0x61   : > { %s1178_s23 = smul.u32 (!%p1592_p8), 96, %s1724_s17  ;;  %s235_s6 = scalar_lea.sflag (!%p1592_p8), [#allocation4], %s1724_s17 }
  0x62   : > { %p1853_p4 = scmp.ne.s32.totalorder (!%p1592_p8), %s1846_s24, 0 }
  0x63   : > { %s1728_s9 = scalar_lea.vmem (!%p1592_p8), [#allocation3], %s1178_s23 }
  0x67   : > { %1482 = dma.done.wait (%p1853_p4), %s235_s6, 1536  }
  0x68   : > { %1484 = vsyncadd (%p1853_p4), %s235_s6, 4294965760  ;;  %p1854_p7 = scmp.eq.s32.totalorder %s1573_s22, 0 }
  0x6a   : > { %1486 = dma.done.wait (%p1854_p7), [#allocation7], 8192   ;;  %p1855_p8 = pmov %p1854_p7 }
  0x6b   : > { %v1518_v0 = vmov 0   ;;  %v1255_v1 = vld [vmem:[#allocation6 + $0x4] ss:$8 sps:$4 sm:$0xff]   ;;  %v1257_v2 = vld [vmem:[#allocation6] ss:$8 sps:$4 sm:$0xff]   ;;  %v284_v36 = vld [vmem:[%s1728_s9 + $0x10] sm:$0xff] }
  0x6c   : > { %1488 = vsyncadd (%p1855_p8), [#allocation7], 4294959104  ;;  %278 = vst [vmem:[#allocation2 + $0x10] sm:$0xff] %v1518_v0  ;;  %698 = vmatprep.mubr.bf16.mxu1 %v1518_v0  ;;  %613 = vmatprep.subr.bf16.mxu0 %v1255_v1  ;;  %v1258_v3 = vld [vmem:[#allocation6 + $0x14] ss:$8 sps:$4 sm:$0xff]   ;;  %v283_v34 = vld [vmem:[%s1728_s9 + $0x8] sm:$0xff] }
  0x6d   : > { %281 = vst [vmem:[#allocation2 + $0x28] sm:$0xff] %v1518_v0  ;;  %614 = vmatpush1.bf16.msra.mxu0 %v1257_v2  ;;  %v1260_v4 = vld [vmem:[#allocation6 + $0x10] ss:$8 sps:$4 sm:$0xff]   ;;  %v1261_v5 = vld [vmem:[#allocation6 + $0x24] ss:$8 sps:$4 sm:$0xff]   ;;  %vm302_vm0 = vcmask 359424  }
  0x6e   : > { %615 = vmatprep.subr.bf16.mxu0 %v1258_v3  ;;  %v1263_v6 = vld [vmem:[#allocation6 + $0x20] ss:$8 sps:$4 sm:$0xff]   ;;  %v1264_v7 = vld [vmem:[#allocation6 + $0x34] ss:$8 sps:$4 sm:$0xff]   ;;  %v1266_v8 = vld [vmem:[#allocation6 + $0x30] ss:$8 sps:$4 sm:$0xff]  }
  0x6f   : > { %v1279_v9 = vld [vmem:[#allocation6 + $0x104] ss:$8 sps:$4 sm:$0xff]   ;;  %v1283_v11 = vld [vmem:[#allocation6 + $0x100] ss:$8 sps:$4 sm:$0xff]   ;;  %v1285_v12 = vld [vmem:[#allocation6 + $0x114] ss:$8 sps:$4 sm:$0xff]  }
  0x70   : > { %v1267_v10 = vld [vmem:[#allocation6 + $0x44] ss:$8 sps:$4 sm:$0xff]   ;;  %666 = vmatprep.subr.bf16.mxu1 %v1279_v9  ;;  %v1269_v13 = vld [vmem:[#allocation6 + $0x40] ss:$8 sps:$4 sm:$0xff]   ;;  %v1270_v14 = vld [vmem:[#allocation6 + $0x54] ss:$8 sps:$4 sm:$0xff]  }
  0x71   : > { %616 = vmatpush1.bf16.msra.mxu0 %v1260_v4  ;;  %667 = vmatpush1.bf16.msra.mxu1 %v1283_v11  ;;  %v1289_v15 = vld [vmem:[#allocation6 + $0x110] ss:$8 sps:$4 sm:$0xff]   ;;  %v1291_v16 = vld [vmem:[#allocation6 + $0x124] ss:$8 sps:$4 sm:$0xff]   ;;  %v1295_v18 = vld [vmem:[#allocation6 + $0x120] ss:$8 sps:$4 sm:$0xff]  }
  0x72   : > { %617 = vmatprep.subr.bf16.mxu0 %v1261_v5  ;;  %668 = vmatprep.subr.bf16.mxu1 %v1285_v12  ;;  %v1272_v17 = vld [vmem:[#allocation6 + $0x50] ss:$8 sps:$4 sm:$0xff]   ;;  %v1297_v19 = vld [vmem:[#allocation6 + $0x134] ss:$8 sps:$4 sm:$0xff]   ;;  %v1273_v20 = vld [vmem:[#allocation6 + $0x64] ss:$8 sps:$4 sm:$0xff]  }
  0x73   : > { %v1301_v21 = vld [vmem:[#allocation6 + $0x130] ss:$8 sps:$4 sm:$0xff]   ;;  %v1275_v22 = vld [vmem:[#allocation6 + $0x60] ss:$8 sps:$4 sm:$0xff]   ;;  %v1303_v23 = vld [vmem:[#allocation6 + $0x144] ss:$8 sps:$4 sm:$0xff]  }
  0x74   : > { %v1276_v24 = vld [vmem:[#allocation6 + $0x74] ss:$8 sps:$4 sm:$0xff]   ;;  %v1278_v25 = vld [vmem:[#allocation6 + $0x70] ss:$8 sps:$4 sm:$0xff]   ;;  %v1307_v26 = vld [vmem:[#allocation6 + $0x140] ss:$8 sps:$4 sm:$0xff]  }
  0x75   : > { %618 = vmatpush1.bf16.msra.mxu0 %v1263_v6  ;;  %669 = vmatpush1.bf16.msra.mxu1 %v1289_v15  ;;  %v1309_v27 = vld [vmem:[#allocation6 + $0x154] ss:$8 sps:$4 sm:$0xff]   ;;  %v1281_v28 = vld [vmem:[#allocation6 + $0x84] ss:$8 sps:$4 sm:$0xff]   ;;  %v1313_v29 = vld [vmem:[#allocation6 + $0x150] ss:$8 sps:$4 sm:$0xff]  }
  0x76   : > { %619 = vmatprep.subr.bf16.mxu0 %v1264_v7  ;;  %670 = vmatprep.subr.bf16.mxu1 %v1291_v16  ;;  %v1284_v30 = vld [vmem:[#allocation6 + $0x80] ss:$8 sps:$4 sm:$0xff]   ;;  %v1287_v31 = vld [vmem:[#allocation6 + $0x94] ss:$8 sps:$4 sm:$0xff]   ;;  %v1315_v32 = vld [vmem:[#allocation6 + $0x164] ss:$8 sps:$4 sm:$0xff]  }
  0x77   : > { %v1319_v33 = vld [vmem:[#allocation6 + $0x160] ss:$8 sps:$4 sm:$0xff]   ;;  %v1290_v37 = vld [vmem:[#allocation6 + $0x90] ss:$8 sps:$4 sm:$0xff]   ;;  %v1321_v38 = vld [vmem:[#allocation6 + $0x174] ss:$8 sps:$4 sm:$0xff]  }
  0x78   : > { %v286_v35 = vld [vmem:[%s1728_s9 + $0x20] sm:$0xff]  ;;  %v287_v40 = vld [vmem:[%s1728_s9 + $0x28] sm:$0xff]  ;;  %v1749_v42 = vld [vmem:[%s1728_s9 + $0x18] sm:$0xff]  ;;  %s1060_s12 = sshll.u32 %s1724_s17, 5  ;;  %s1131_s29 = sshll.u32 %s1573_s22, 9 }
  0x79   : > { %620 = vmatpush1.bf16.msra.mxu0 %v1266_v8  ;;  %671 = vmatpush1.bf16.msra.mxu1 %v1295_v18  ;;  %v295_v39 = vpack.c.bf16 %v286_v35, %v283_v34  ;;  %v1746_v41 = vld [vmem:[%s1728_s9] sm:$0xff]  ;;  %v296_v43 = vpack.c.bf16 %v287_v40, %v284_v36  ;;  %v1754_v45 = vld [vmem:[%s1728_s9 + $0x38] sm:$0xff]  ;;  %v1757_v46 = vld [vmem:[%s1728_s9 + $0x50] sm:$0xff]  ;;  %s272_s13 = scalar_lea.vmem [#allocation9], %s1060_s12  ;;  %s1791_s14 = scalar_lea.hbm %s1842_s5, %s1131_s29 }
  0x7a   : > { %621 = vmatprep.subr.bf16.mxu0 %v1267_v10  ;;  %672 = vmatprep.subr.bf16.mxu1 %v1297_v19  ;;  %v294_v44 = vpack.c.bf16 %v1749_v42, %v1746_v41  ;;  %v290_v47 = vld [vmem:[%s1728_s9 + $0x40] sm:$0xff]  ;;  %v298_v48 = vpack.c.bf16 %v1757_v46, %v1754_v45  ;;  %v293_v49 = vld [vmem:[%s1728_s9 + $0x58] sm:$0xff]  ;;  %v1764_v50 = vld [vmem:[%s1728_s9 + $0x30] sm:$0xff]  ;;  %s957_s7 = sshll.u32 %s272_s13, 4  ;;  %s944_s15 = scalar_lea.sflag [#allocation5], %s1724_s17  ;;  %s1793_s7 = int_to_ptr.vmem [resolvable:$true] %s957_s7 }
  0x7b   : > { %v1767_v51 = vld [vmem:[%s1728_s9 + $0x48] sm:$0xff]  ;;  %645 = vmatprep.mubr.bf16.mxu0 %v295_v39  ;;  %303 = vst.msk [vmem:[#allocation2 + $0x10] sm:$0xff] %vm302_vm0, %v296_v43  ;;  %v299_v53 = vpack.c.bf16 %v293_v49, %v290_v47  ;;  %v1325_v56 = vld [vmem:[#allocation6 + $0x170] ss:$8 sps:$4 sm:$0xff]   ;;  %v1327_v57 = vld [vmem:[#allocation8 + $0x40] sm:$0xff]   ;;  %s1437_s23 = scalar_lea.vmem %s1793_s7, 512 }
  0x7c   : > { %v1293_v52 = vld [vmem:[#allocation6 + $0xa4] ss:$8 sps:$4 sm:$0xff]   ;;  %v297_v54 = vpack.c.bf16 %v1767_v51, %v1764_v50  ;;  %v1296_v55 = vld [vmem:[#allocation6 + $0xa0] ss:$8 sps:$4 sm:$0xff]   ;;  %v1299_v58 = vld [vmem:[#allocation6 + $0xb4] ss:$8 sps:$4 sm:$0xff]   ;;  %p1438_p11 = scmp.ne.s32.totalorder %s1793_s7, %s1437_s23 }
  0x7d   : > { %622 = vmatpush1.bf16.msra.mxu0 %v1269_v13  ;;  %673 = vmatpush1.bf16.msra.mxu1 %v1301_v21  ;;  %306 = vst.msk [vmem:[#allocation2 + $0x28] sm:$0xff] %vm302_vm0, %v299_v53  ;;  %v1302_v59 = vld [vmem:[#allocation6 + $0xb0] ss:$8 sps:$4 sm:$0xff]   ;;  %v1328_v60 = vld [vmem:[#allocation8] sm:$0xff]   ;;  %v1329_v61 = vld [vmem:[#allocation8 + $0x48] sm:$0xff]   ;;  %p1856_p0 = scmp.ne.s32.totalorder %s1851_s30, 0 }
  0x7e   : > { %623 = vmatprep.subr.bf16.mxu0 %v1270_v14  ;;  %674 = vmatprep.subr.bf16.mxu1 %v1303_v23  ;;  %v1305_v63 = vld [vmem:[#allocation6 + $0xc4] ss:$8 sps:$4 sm:$0xff]   ;;  %v1308_v1 = vld [vmem:[#allocation6 + $0xc0] ss:$8 sps:$4 sm:$0xff]   ;;  %v1311_v3 = vld [vmem:[#allocation6 + $0xd4] ss:$8 sps:$4 sm:$0xff]  }
  0x7f   : > { %v1330_v2 = vld [vmem:[#allocation8 + $0x8] sm:$0xff]   ;;  %v1331_v4 = vld [vmem:[#allocation8 + $0x50] sm:$0xff]   ;;  %v1333_v8 = vld [vmem:[#allocation8 + $0x58] sm:$0xff]   ;;  %p1439_p1 = pnand %p1438_p11, %p1856_p0  ;;  %s1519_s22 = smov [#allocation9]  }
  0x80   : > { %v1332_v5 = vld [vmem:[#allocation8 + $0x10] sm:$0xff]   ;;  %v1317_v9 = vld [vmem:[#allocation6 + $0xe4] ss:$8 sps:$4 sm:$0xff]   ;;  %v1334_v10 = vld [vmem:[#allocation8 + $0x18] sm:$0xff]   ;;  %s1441_s6 = sshll.u32 %s1519_s22, 4  ;;  %s1442_s6 = int_to_ptr.vmem [resolvable:$false] %s1441_s6 }
  0x81   : > { %624 = vmatpush1.bf16.msra.mxu0 %v1272_v17  ;;  %675 = vmatpush1.bf16.msra.mxu1 %v1307_v26  ;;  %v1314_v7 = vld [vmem:[#allocation6 + $0xd0] ss:$8 sps:$4 sm:$0xff]   ;;  %v1320_v11 = vld [vmem:[#allocation6 + $0xe0] ss:$8 sps:$4 sm:$0xff]   ;;  %v1323_v12 = vld [vmem:[#allocation6 + $0xf4] ss:$8 sps:$4 sm:$0xff]   ;;  %p1440_p3 = pneg %p1439_p1  ;;  %p1444_p5 = scmp.lt.s32.totalorder %s1793_s7, %s1442_s6 }
  0x82   : > { %625 = vmatprep.subr.bf16.mxu0 %v1273_v20  ;;  %676 = vmatprep.subr.bf16.mxu1 %v1309_v27  ;;  %v309_v62 = vld [vmem:[#allocation2 + $0x10] sm:$0xff]  ;;  %v1326_v14 = vld [vmem:[#allocation6 + $0xf0] ss:$8 sps:$4 sm:$0xff]   ;;  %v1337_v15 = vld [vmem:[#allocation8 + $0x68] sm:$0xff]   ;;  %s1443_s9 = scalar_lea.vmem %s1442_s6, 1024 }
  0x83   : > { %v1336_v13 = vld [vmem:[#allocation8 + $0x20] sm:$0xff]   ;;  %v1338_v16 = vld [vmem:[#allocation8 + $0x28] sm:$0xff]   ;;  %v1339_v17 = vld [vmem:[#allocation8 + $0x70] sm:$0xff]   ;;  %p1445_p9 = scmp.lt.s32.totalorder %s1443_s9, %s1437_s23 }
  0x84   : > { %v312_v6 = vld [vmem:[#allocation2 + $0x28] sm:$0xff]  ;;  %v1340_v18 = vld [vmem:[#allocation8 + $0x30] sm:$0xff]  }
  0x85   : > { %626 = vmatpush1.bf16.msra.mxu0 %v1275_v22  ;;  %677 = vmatpush1.bf16.msra.mxu1 %v1313_v29  ;;  %v1341_v19 = vld [vmem:[#allocation8 + $0x78] sm:$0xff]   ;;  %p1446_p12 = por %p1445_p9, %p1444_p5 }
  0x86   : > { %627 = vmatprep.subr.bf16.mxu0 %v1276_v24  ;;  %678 = vmatprep.subr.bf16.mxu1 %v1315_v32  ;;  %v1342_v20 = vld [vmem:[#allocation8 + $0x38] sm:$0xff]   ;;  %v361_v32 = vld [vmem:[%s1839_s2] sm:$0x3] }
  0x87   : > { %p1447_p2 = pnand %p1446_p12, %p1440_p3 }
  0x89   : > { %628 = vmatpush1.bf16.msra.mxu0 %v1278_v25  ;;  %679 = vmatpush1.bf16.msra.mxu1 %v1319_v33  ;;  %v363_v25 = vlaneseq }
  0x8a   : > { %629 = vmatprep.subr.bf16.mxu0 %v1281_v28  ;;  %680 = vmatprep.subr.bf16.mxu1 %v1321_v38 }
  0x8b   : > { %v364_v28 = vshrl.u32 %v363_v25, 7 }
  0x8d   : > { %630 = vmatpush1.bf16.msra.mxu0 %v1284_v30  ;;  %681 = vmatpush1.bf16.msra.mxu1 %v1325_v56  ;;  %v369_v33 = vsub.s32 1, %v364_v28 }
  0x8e   : > { %631 = vmatprep.subr.bf16.mxu0 %v1287_v31  ;;  %1132 = vmatprep.subr.bf16.mxu1 %v1327_v57  ;;  %v365_v31 = vsub.s32 0, %v364_v28 }
  0x8f   : > { %v370_v35 = vrot.slane %v361_v32, %v369_v33 }
  0x90   : > { %699 = vmatmul.mubr.bf16.vlgmr.msra.gmra.mrb[0].mxu1 %v309_v62  ;;  %v366_v34 = vrot.slane %v361_v32, %v365_v31 }
  0x91   : > { %632 = vmatpush1.bf16.msra.mxu0 %v1290_v37  ;;  %708 = vmatprep.mubr.bf16.mxu1 %v1518_v0  ;;  %v1335_v0 = vld [vmem:[#allocation8 + $0x60] sm:$0xff]  }
  0x92   : > { %633 = vmatprep.subr.bf16.mxu0 %v1293_v52  ;;  %1133 = vmatpush3.bf16.msra.mxu1 %v1328_v60 }
  0x93   : > { %1134 = vmatprep.subr.bf16.mxu1 %v1329_v61 }
  0x95   : > { %634 = vmatpush1.bf16.msra.mxu0 %v1296_v55 }
  0x96   : > { %635 = vmatprep.subr.bf16.mxu0 %v1299_v58  ;;  %1135 = vmatpush3.bf16.msra.mxu1 %v1330_v2 }
  0x97   : > { %1136 = vmatprep.subr.bf16.mxu1 %v1331_v4 }
  0x98   : > { %709 = vmatmul.mubr.bf16.gmra.mrb[4].mxu1 %v312_v6 }
  0x99   : > { %636 = vmatpush1.bf16.msra.mxu0 %v1302_v59 }
  0x9a   : > { %637 = vmatprep.subr.bf16.mxu0 %v1305_v63  ;;  %1137 = vmatpush3.bf16.msra.mxu1 %v1332_v5 }
  0x9b   : > { %1138 = vmatprep.subr.bf16.mxu1 %v1333_v8 }
  0x9d   : > { %638 = vmatpush1.bf16.msra.mxu0 %v1308_v1 }
  0x9e   : > { %639 = vmatprep.subr.bf16.mxu0 %v1311_v3  ;;  %1139 = vmatpush3.bf16.msra.mxu1 %v1334_v10 }
  0x9f   : > { %1140 = vmatprep.subr.bf16.mxu1 %v1335_v0 }
  0xa1   : > { %640 = vmatpush1.bf16.msra.mxu0 %v1314_v7 }
  0xa2   : > { %641 = vmatprep.subr.bf16.mxu0 %v1317_v9  ;;  %1141 = vmatpush3.bf16.msra.mxu1 %v1336_v13 }
  0xa3   : > { %1142 = vmatprep.subr.bf16.mxu1 %v1337_v15 }
  0xa5   : > { %642 = vmatpush1.bf16.msra.mxu0 %v1320_v11  ;;  %v1109_v11 = vld [vmem:[%s1841_s4] ss:$0 sm:$0xff] }
  0xa6   : > { %643 = vmatprep.subr.bf16.mxu0 %v1323_v12  ;;  %1143 = vmatpush3.bf16.msra.mxu1 %v1338_v16 }
  0xa7   : > { %1144 = vmatprep.subr.bf16.mxu1 %v1339_v17 }
  0xa9   : > { %644 = vmatpush1.bf16.msra.mxu0 %v1326_v14 }
  0xaa   : > { %1145 = vmatpush3.bf16.msra.mxu1 %v1340_v18 }
  0xab   : > { %1146 = vmatprep.subr.bf16.mxu1 %v1341_v19 }
  0xac   : > { %646 = vmatmul.mubr.bf16.vlgmr.msra.gmra.mrb[0].mxu0 %v294_v44 }
  0xad   : > { %655 = vmatprep.mubr.bf16.mxu0 %v298_v48 }
  0xae   : > { %1147 = vmatpush3.bf16.msra.mxu1 %v1342_v20 }
  0xb4   : > { %656 = vmatmul.mubr.bf16.gmra.mrb[4].mxu0 %v297_v54 }
 0x163   : > { %v700_v21 = vpop.f32.mrb[0].mxu1 }
 0x164   : > { %v702_v22 = vpop.f32.mrb[1].mxu1 }
 0x165   : > { %v704_v23 = vpop.f32.mrb[2].mxu1 }
 0x166   : > { %v706_v24 = vpop.f32.mrb[3].mxu1 }
 0x16b   : > { %v710_v26 = vpop.f32.mrb[4].mxu1 }
 0x16c   : > { %v712_v27 = vpop.f32.mrb[5].mxu1 }
 0x16d   : > { %v714_v29 = vpop.f32.mrb[6].mxu1 }
 0x16e   : > { %v716_v30 = vpop.f32.mrb[7].mxu1 }
 0x17f   : > { %v647_v36 = vpop.f32.mrb[0].mxu0 }
 0x180   : > { %v648_v37 = vadd.f32 %v647_v36, %v366_v34  ;;  %v649_v38 = vpop.f32.mrb[1].mxu0 }
 0x181   : > { %v650_v39 = vadd.f32 %v649_v38, %v370_v35  ;;  %v651_v40 = vpop.f32.mrb[2].mxu0 }
 0x182   : > { %v701_v41 = vadd.f32 %v700_v21, %v648_v37  ;;  %v652_v42 = vadd.f32 %v651_v40, %v366_v34  ;;  %v653_v43 = vpop.f32.mrb[3].mxu0 }
 0x183   : > { %v703_v44 = vadd.f32 %v702_v22, %v650_v39  ;;  %v654_v45 = vadd.f32 %v653_v43, %v370_v35 }
 0x184   : > { %v705_v46 = vadd.f32 %v704_v23, %v652_v42  ;;  %v719_v48 = vmax.f32 %v701_v41, 0.0 }
 0x185   : > { %v707_v47 = vadd.f32 %v706_v24, %v654_v45  ;;  %v720_v50 = vmax.f32 %v703_v44, 0.0 }
 0x186   : > { %v721_v49 = vmax.f32 %v705_v46, 0.0 }
 0x187   : > { %v722_v51 = vmax.f32 %v707_v47, 0.0  ;;  %v657_v52 = vpop.f32.mrb[4].mxu0 }
 0x188   : > { %v727_v53 = vpack.c.bf16 %v721_v49, %v719_v48  ;;  %v658_v54 = vadd.f32 %v657_v52, %v366_v34  ;;  %v659_v55 = vpop.f32.mrb[5].mxu0 }
 0x189   : > { %v660_v56 = vadd.f32 %v659_v55, %v370_v35  ;;  %v661_v57 = vpop.f32.mrb[6].mxu0  ;;  %v728_v58 = vpack.c.bf16 %v722_v51, %v720_v50 }
 0x18a   : > { %v711_v59 = vadd.f32 %v710_v26, %v658_v54  ;;  %v662_v60 = vadd.f32 %v661_v57, %v366_v34  ;;  %v663_v61 = vpop.f32.mrb[7].mxu0 }
 0x18b   : > { %v713_v62 = vadd.f32 %v712_v27, %v660_v56  ;;  %v664_v63 = vadd.f32 %v663_v61, %v370_v35  ;;  %898 = vmatprep.mubr.bf16.mxu1 %v728_v58 }
 0x18c   : > { %v715_v1 = vadd.f32 %v714_v29, %v662_v60  ;;  %899 = vmatmul.mubr.bf16.vlgmr.msra.gmra.mrb[8].mxu1 %v727_v53  ;;  %v723_v3 = vmax.f32 %v711_v59, 0.0 }
 0x18d   : > { %v717_v2 = vadd.f32 %v716_v30, %v664_v63  ;;  %v724_v5 = vmax.f32 %v713_v62, 0.0 }
 0x18e   : > { %v725_v4 = vmax.f32 %v715_v1, 0.0 }
 0x18f   : > { %v726_v6 = vmax.f32 %v717_v2, 0.0 }
 0x190   : > { %v729_v7 = vpack.c.bf16 %v725_v4, %v723_v3 }
 0x191   : > { %v730_v8 = vpack.c.bf16 %v726_v6, %v724_v5 }
 0x193   : > { %906 = vmatprep.mubr.bf16.mxu1 %v730_v8 }
 0x194   : > { %907 = vmatmul.mubr.bf16.gmra.mrb[12].mxu1 %v729_v7 }
 0x25f   : > { %v1148_v9 = vpop.f32.mrb[8].mxu1 }
 0x260   : > { %v1149_v10 = vpop.f32.mrb[9].mxu1 }
 0x261   : > { %v1150_v0 = vadd.f32 %v1149_v10, %v1148_v9  ;;  %v1151_v12 = vpop.f32.mrb[10].mxu1 }
 0x262   : > { %v1152_v13 = vpop.f32.mrb[11].mxu1 }
 0x263   : > { %v1153_v14 = vadd.f32 %v1152_v13, %v1151_v12  ;;  %v901_v15 = vadd.f32 %v1150_v0, %v1109_v11 }
 0x265   : > { %v904_v16 = vadd.f32 %v1153_v14, %v1109_v11  ;;  %v915_v17 = vmul.f32 %v901_v15, %v901_v15 }
 0x267   : > { %v1154_v18 = vpop.f32.mrb[12].mxu1  ;;  %919 = vadd.xlane.f32.xlu0 %v915_v17  ;;  %v916_v22 = vmul.f32 %v904_v16, %v904_v16 }
 0x268   : > { %v1155_v19 = vpop.f32.mrb[13].mxu1 }
 0x269   : > { %v1156_v20 = vadd.f32 %v1155_v19, %v1154_v18  ;;  %v1157_v21 = vpop.f32.mrb[14].mxu1 }
 0x26a   : > { %v1158_v23 = vpop.f32.mrb[15].mxu1 }
 0x26b   : > { %v1159_v24 = vadd.f32 %v1158_v23, %v1157_v21  ;;  %921 = vadd.xlane.f32.xlu0 %v916_v22  ;;  %v909_v25 = vadd.f32 %v1156_v20, %v1109_v11 }
 0x26d   : > { %v912_v26 = vadd.f32 %v1159_v24, %v1109_v11  ;;  %v917_v27 = vmul.f32 %v909_v25, %v909_v25 }
 0x26f   : > { %923 = vadd.xlane.f32.xlu1 %v917_v27  ;;  %v918_v28 = vmul.f32 %v912_v26, %v912_v26 }
 0x273   : > { %925 = vadd.xlane.f32.xlu1 %v918_v28 }
 0x2f4   : > { %v920_v29 = vpop.xlane.xlu0 %919 }
 0x2f5   : > { %v927_v30 = vmax.f32 %v920_v29, 1e-24 }
 0x2f7   : > { %1343 = vrsqrt.f32 %v927_v30 }
 0x2f8   : > { %v922_v31 = vpop.xlane.xlu0 %921 }
 0x2f9   : > { %v928_v32 = vmax.f32 %v922_v31, 1e-24 }
 0x2fb   : > { %1345 = vrsqrt.f32 %v928_v32 }
 0x2fc   : > { %v924_v33 = vpop.xlane.xlu1 %923 }
 0x2fd   : > { %v929_v34 = vmax.f32 %v924_v33, 1e-24 }
 0x2ff   : > { %1347 = vrsqrt.f32 %v929_v34 }
 0x300   : > { %v926_v35 = vpop.xlane.xlu1 %925 }
 0x301   : > { %v1344_v36 = vpop.eup %1343  ;;  %v930_v37 = vmax.f32 %v926_v35, 1e-24 }
 0x302   : > { %v935_v38 = vmul.f32 %v1344_v36, %v901_v15 }
 0x303   : > { %1349 = vrsqrt.f32 %v930_v37 }
 0x304   : > { %939 = vst [vmem:[%s272_s13] sm:$0xff] %v935_v38 }
 0x305   : > { %v1346_v39 = vpop.eup %1345 }
 0x306   : > { %v936_v40 = vmul.f32 %v1346_v39, %v904_v16 }
 0x308   : > { %940 = vst [vmem:[%s272_s13 + $0x8] sm:$0xff] %v936_v40 }
 0x309   : > { %v1348_v41 = vpop.eup %1347 }
 0x30a   : > { %v937_v42 = vmul.f32 %v1348_v41, %v909_v25 }
 0x30c   : > { %941 = vst [vmem:[%s272_s13 + $0x10] sm:$0xff] %v937_v42 }
 0x30d   : > { %v1350_v43 = vpop.eup %1349 }
 0x30e   : > { %v938_v44 = vmul.f32 %v1350_v43, %v912_v26 }
 0x310   : > { %942 = vst [vmem:[%s272_s13 + $0x18] sm:$0xff] %v938_v44 }
 0x311   : > { %1450 = shalt.err (!%p1447_p2)
}
 0x312   : > { %s1451_s24 = scalar_lea.hbm %s1791_s14, 512  ;;  %s1455_s11 = scalar_lea.hbm %s1842_s5, 1024 }
 0x313   : > { %p1452_p13 = scmp.ne.s32.totalorder %s1791_s14, %s1451_s24  ;;  %p1456_p4 = scmp.lt.u32.totalorder %s1791_s14, %s1842_s5 }
 0x314   : > { %p1457_p7 = scmp.lt.u32.totalorder %s1455_s11, %s1451_s24  ;;  %p1459_p11 = scmp.lt.u32.totalorder %s1451_s24, %s1791_s14 }
 0x315   : > { %p1453_p6 = pnand %p1452_p13, %p1856_p0 }
 0x316   : > { %p1458_p8 = por %p1457_p7, %p1456_p4 }
 0x317   : > { %p1454_p10 = pneg %p1453_p6 }
 0x318   : > { %p1460_p1 = por %p1459_p11, %p1458_p8 }
 0x31a   : > { %p1461_p3 = pnand %p1460_p1, %p1454_p10 }
 0x31c   : > { %1464 = shalt.err (!%p1461_p3)
}
 0x31d   : > { %s1520_s29 = smov 128   ;;  %s1521_s10 = smov 8  }
 0x31e   : > { %1189 = dma.vmem_to_hbm [thread:$0]  (%p1856_p0), %s1793_s7, 512, %s1791_s14, %s944_s15, %s1520_s29, %s1520_s29, %s1521_s10  }
 0x31f PF: > { %s972_s28 = sand.u32 1, %s1495_s18   ;;  %p1857_p5 = scmp.ne.s32.totalorder %s1847_s25, 0 }
 0x320   : > { %p1858_p9 = scmp.ge.s32.totalorder %s1507_s21, 2  ;;  %s973_s23 = scalar_lea.sflag [#allocation5], %s972_s28 }
 0x322   : > { %p1203_p12 = pnand %p1858_p9, %p1857_p5 }
 0x324   : > { %1490 = dma.done.wait (!%p1203_p12), %s973_s23, 512  }
 0x325   : > { %1492 = vsyncadd (!%p1203_p12), %s973_s23, 4294966784  ;;  %p19_p2 = scmp.ge.s32.totalorder %s1662_s16, 4   ;;  %s1859_s18 = smov %s1499_s19 }
 0x326   : > { %s1860_s19 = smov %s1503_s20  ;;  %s1861_s20 = smov %s1671_s27 }
 0x327   : > { %s1862_s21 = smov %s1662_s16  ;;  %21 = sbr.rel (!%p19_p2) target bundleno = 6 (0x6), region = 93 }
 0x32e   :  { %978 = vsyncpa [#allocation4], 1 }
 0x32f   :  { %980 = vsyncpa [#allocation4 + $0x1], 1 }
 0x330   :  { %981 = vsyncpa [#allocation7], 1 }
 0x331   :  { %982 = vsyncpa [#allocation5], 1 }
 0x332   :  { %984 = vsyncpa [#allocation5 + $0x1], 1 }

</bundles_post_ra>
